<compile_context>
chip_gen: v7x
topology: tpu7x:2x2x1
jax: 0.10.0
libtpu: 0.0.40
codegen_flags: <defaults>
</compile_context>

<pallas_src>
import math

import jax
import jax.numpy as jnp
from jax.experimental import pallas as pl
from jax.experimental.pallas import tpu as pltpu


# --------------------------------------------------------------------------- #
# Sinusoidal table (identical to the PyTorch __init__).
# --------------------------------------------------------------------------- #
def make_pos_embedding(emb_size: int, maxlen: int, dtype=jnp.float32):
    if emb_size % 2 != 0:
        raise Exception("Embedding size must be even")
    den = jnp.exp(-jnp.arange(0, emb_size, 2, dtype=jnp.float32)
                  * math.log(10000.0) / emb_size)             # (emb_size/2,)
    pos = jnp.arange(0, maxlen, dtype=jnp.float32).reshape(maxlen, 1)
    arg = pos * den                                            # (maxlen, emb/2)
    pe = jnp.zeros((maxlen, emb_size), dtype=jnp.float32)
    pe = pe.at[:, 0::2].set(jnp.sin(arg))
    pe = pe.at[:, 1::2].set(jnp.cos(arg))
    return pe.astype(dtype)


# --------------------------------------------------------------------------- #
# Helpers.
# --------------------------------------------------------------------------- #
_TARGET_BLOCK_BYTES = 4 << 20        # ~4 MiB token block per grid step
_MEGACORE_MIN_BYTES = 2 << 20        # split single-step grids above this size


def _round_down(x: int, m: int) -> int:
    return (x // m) * m


def _sublane_multiple(dtype) -> int:
    """Rows per packed sublane group: 8 (32-bit), 16 (16-bit), 32 (8-bit)."""
    bits = jnp.dtype(dtype).itemsize * 8
    return max(8, 256 // bits)


def _vmem_capacity_bytes(default: int = 64 << 20) -> int:
    try:
        return int(pltpu.get_tpu_info().vmem_capacity_bytes)
    except Exception:
        return default  # conservative (v7x-sized) if the query is unavailable


def _vmem_limit(need_bytes: int) -> int:
    phys = _vmem_capacity_bytes()
    # v7x has 64 MiB physical VMEM -> clamp at 48 MiB; v5e/v6e (128 MiB) -> 64.
    cap = (48 << 20) if phys <= (64 << 20) else (64 << 20)
    return int(min(max(need_bytes, 16 << 20), cap))


# --------------------------------------------------------------------------- #
# Kernel body (shared by both layouts; jnp broadcasting handles the PE tile).
# --------------------------------------------------------------------------- #
def _add_pe_kernel(tok_ref, pe_ref, out_ref):
    # 3D path : tok/out (TB, TL, E), pe (TL, E)
    # flat path: tok/out (TB, TN),    pe (1, TN)
    # Explicit cast keeps the downcast to the output dtype intentional.
    out_ref[...] = (tok_ref[...] + pe_ref[...]).astype(out_ref.dtype)


# --------------------------------------------------------------------------- #
# Path A: E % 128 == 0 -> native (B, L, E) layout is already lane-dense.
# --------------------------------------------------------------------------- #
def _forward_3d(tok, pe, *, in_place):
    B, L, E = tok.shape
    itok = jnp.dtype(tok.dtype).itemsize
    ipe = jnp.dtype(pe.dtype).itemsize
    sub = _sublane_multiple(tok.dtype)
    target = _TARGET_BLOCK_BYTES

    row_bytes = E * itok
    if L * row_bytes <= target:                 # whole sequence fits: block over batch
        TL = L
        TB = max(1, min(B, target // max(1, L * row_bytes)))
    else:
        TB = 1
        TL = min(L, max(sub, _round_down(target // row_bytes, sub)))

    grid_l = pl.cdiv(L, TL)
    grid_b = pl.cdiv(B, TB)

    # Keep both v7x TensorCores fed: guarantee >= 2 parallel grid steps
    # whenever the tensor is big enough to matter.
    if grid_l * grid_b < 2 and B * L * row_bytes >= _MEGACORE_MIN_BYTES:
        if TB >= 2:
            TB = pl.cdiv(TB, 2)
            grid_b = pl.cdiv(B, TB)
        elif L >= 2 * sub:
            TL = max(sub, _round_down(L // 2, sub))
            grid_l = pl.cdiv(L, TL)

    need = 2 * (2 * TB * TL * E * itok + TL * E * ipe) + (1 << 20)

    return pl.pallas_call(
        _add_pe_kernel,
        out_shape=jax.ShapeDtypeStruct((B, L, E), tok.dtype),
        grid_spec=pltpu.PrefetchScalarGridSpec(
            num_scalar_prefetch=0,
            # Batch innermost: PE block index constant across consecutive
            # steps -> PE tile fetched once per L-tile, not once per (l, b).
            grid=(grid_l, grid_b),
            in_specs=[
                pl.BlockSpec((TB, TL, E), lambda l, b: (b, l, 0)),   # tokens
                pl.BlockSpec((TL, E), lambda l, b: (l, 0)),          # PE table
            ],
            out_specs=pl.BlockSpec((TB, TL, E), lambda l, b: (b, l, 0)),
        ),
        compiler_params=pltpu.CompilerParams(
            dimension_semantics=("parallel", "parallel"),
            vmem_limit_bytes=_vmem_limit(need),
        ),
        input_output_aliases=({0: 0} if in_place else {}),
    )(tok, pe)


# --------------------------------------------------------------------------- #
# Path B: E not lane-aligned -> flatten (L, E) -> L*E so stores are lane-dense.
# Correct for any tile boundary: flat index n <-> (l = n // E, e = n % E)
# identically on tokens and on the PE table.
# --------------------------------------------------------------------------- #
def _forward_flat(tok, pe, *, in_place):
    B, L, E = tok.shape
    N = L * E
    itok = jnp.dtype(tok.dtype).itemsize
    ipe = jnp.dtype(pe.dtype).itemsize
    target = _TARGET_BLOCK_BYTES

    tok2 = tok.reshape(B, N)
    pe2 = pe.reshape(1, N)

    # Lane tile (multiple of 128, or the full flattened row).
    if N <= 128:
        TN = N
    else:
        base_rows = B if B < 8 else 8
        if base_rows * N * itok <= target:
            TN = N
        else:
            TN = min(_round_down(N, 128),
                     max(128, _round_down(target // (base_rows * itok), 128)))

    # Batch (sublane) tile: multiple of 8 or the full batch.
    rows_fit = max(1, target // max(1, TN * itok))
    if rows_fit >= B or B <= 8:
        TB = B
    else:
        TB = max(8, _round_down(rows_fit, 8))

    grid_n = pl.cdiv(N, TN)
    grid_b = pl.cdiv(B, TB)

    # Guarantee >= 2 parallel grid steps for v7x megacore on non-tiny tensors.
    if grid_n * grid_b < 2 and B * N * itok >= _MEGACORE_MIN_BYTES:
        if TN >= 256:
            TN = _round_down(pl.cdiv(TN, 2), 128)
            grid_n = pl.cdiv(N, TN)
        elif B > 8:
            TB = max(8, _round_down(pl.cdiv(B, 2), 8))
            grid_b = pl.cdiv(B, TB)

    need = 2 * (2 * TB * TN * itok + TN * ipe) + (1 << 20)

    out2 = pl.pallas_call(
        _add_pe_kernel,
        out_shape=jax.ShapeDtypeStruct((B, N), tok.dtype),
        grid_spec=pltpu.PrefetchScalarGridSpec(
            num_scalar_prefetch=0,
            # Batch innermost: PE chunk re-used across consecutive b steps.
            grid=(grid_n, grid_b),
            in_specs=[
                pl.BlockSpec((TB, TN), lambda n, b: (b, n)),    # tokens (flat)
                pl.BlockSpec((1, TN), lambda n, b: (0, n)),     # PE (flat)
            ],
            out_specs=pl.BlockSpec((TB, TN), lambda n, b: (b, n)),
        ),
        compiler_params=pltpu.CompilerParams(
            dimension_semantics=("parallel", "parallel"),
            vmem_limit_bytes=_vmem_limit(need),
        ),
        input_output_aliases=({0: 0} if in_place else {}),
    )(tok2, pe2)
    return out2.reshape(B, L, E)


# --------------------------------------------------------------------------- #
# Public forward.
# --------------------------------------------------------------------------- #
def positional_encoding_forward(token_embedding: jax.Array,
                                pos_embedding: jax.Array,
                                *,
                                in_place: bool = False,
                                small_fallback_bytes: int = 0) -> jax.Array:
    """token_embedding: (B, L, E); pos_embedding: (L, E). Dropout p=0.0 -> identity.

    in_place: alias the output onto token_embedding (callers should donate it).
    small_fallback_bytes: below this total size use a plain XLA add (launch
        overhead dominates tiny shapes); 0 (default) always runs the kernel.
    """
    B, L, E = token_embedding.shape
    assert pos_embedding.shape == (L, E), "pos_embedding must be pre-sliced to (L, E)"

    # Match output dtype to tokens; for bf16 tokens this also halves the PE
    # tile's VMEM footprint and keeps the add on the native bf16 VPU path.
    if pos_embedding.dtype != token_embedding.dtype:
        pos_embedding = pos_embedding.astype(token_embedding.dtype)

    total_bytes = B * L * E * jnp.dtype(token_embedding.dtype).itemsize
    if total_bytes < small_fallback_bytes:
        return token_embedding + pos_embedding[None, :, :]

    # TODO(synk): dropout has p=0.0 in this module so it is the identity; a
    # nonzero dropout would need pltpu.prng_seed / pltpu.stateful_bernoulli.
    if E % 128 == 0:
        return _forward_3d(token_embedding, pos_embedding, in_place=in_place)
    return _forward_flat(token_embedding, pos_embedding, in_place=in_place)


if __name__ == "__main__":
    # Small shapes consistent with the module: batch=2, seq(maxlen)=8, emb=32.
    batch, maxlen, emb_size = 2, 8, 32

    key = jax.random.PRNGKey(0)
    token_embedding = jax.random.normal(key, (batch, maxlen, emb_size),
                                        dtype=jnp.float32)
    pos_embedding = make_pos_embedding(emb_size, maxlen)

    out = positional_encoding_forward(token_embedding, pos_embedding)
    out = jax.block_until_ready(out)

    # Reference check (plain JAX, same semantics as the PyTorch forward).
    ref = token_embedding + pos_embedding[None, :, :]
    assert out.shape == (batch, maxlen, emb_size)
    assert out.dtype == token_embedding.dtype
    assert jnp.allclose(out, ref, atol=1e-6, rtol=1e-6)

    print("KERNEL_OK")
</pallas_src>

<mosaic_0001>
module attributes {stable_mosaic.version = 11 : i64} {
  func.func @_add_pe_kernel(%arg0: i32, %arg1: i32, %arg2: memref<2x256xf32, #tpu.memory_space<vmem>>, %arg3: memref<1x256xf32, #tpu.memory_space<vmem>>, %arg4: memref<2x256xf32, #tpu.memory_space<vmem>>) attributes {dimension_semantics = [#tpu.dimension_semantics<parallel>, #tpu.dimension_semantics<parallel>], iteration_bounds = array<i64: 1, 1>, scalar_prefetch = 0 : i64, scratch_operands = 0 : i64, tpu.core_type = #tpu.core_type<tc>, window_params = [{transform_indices = @transform_0, window_bounds = array<i64: 2, 256>}, {transform_indices = @transform_1, window_bounds = array<i64: 1, 256>}, {transform_indices = @transform_2, window_bounds = array<i64: 2, 256>}]} {
    %c0 = arith.constant 0 : index
    %c0_0 = arith.constant 0 : index
    %0 = vector.load %arg2[%c0, %c0_0] : memref<2x256xf32, #tpu.memory_space<vmem>>, vector<2x256xf32>
    %c0_1 = arith.constant 0 : index
    %c0_2 = arith.constant 0 : index
    %1 = vector.load %arg3[%c0_1, %c0_2] : memref<1x256xf32, #tpu.memory_space<vmem>>, vector<1x256xf32>
    %2 = vector.broadcast %1 : vector<1x256xf32> to vector<2x256xf32>
    %3 = arith.addf %0, %2 : vector<2x256xf32>
    %c0_3 = arith.constant 0 : index
    %c0_4 = arith.constant 0 : index
    %4 = vector.load %arg4[%c0_3, %c0_4] : memref<2x256xf32, #tpu.memory_space<vmem>>, vector<2x256xf32>
    tpu.vector_store %arg4[%c0_3, %c0_4], %3 {strides = array<i32>} : memref<2x256xf32, #tpu.memory_space<vmem>>, vector<2x256xf32>,
    return
  }
  func.func @transform_0(%arg0: i32, %arg1: i32) -> (i32, i32) {
    %c0_i32 = arith.constant 0 : i32
    return %arg1, %arg0 : i32, i32
  }
  func.func @transform_1(%arg0: i32, %arg1: i32) -> (i32, i32) {
    %c0_i32 = arith.constant 0 : i32
    %c0_i32_0 = arith.constant 0 : i32
    return %c0_i32, %arg0 : i32, i32
  }
  func.func @transform_2(%arg0: i32, %arg1: i32) -> (i32, i32) {
    %c0_i32 = arith.constant 0 : i32
    return %arg1, %arg0 : i32, i32
  }
}

</mosaic_0001>

<bundles_post_ra>
// kernel: tpu_custom_call.1
= control target key start
LH: loop header
LB: loop body
LE: loop exit
PB: predicated region body
PF: predicated region fallthrough
CT: control target
= control target key end

     0   :  { %7 = vsyncpa [#allocation3], 0  ;;  %s157_s0 = inlined_call_operand.hbm [shape: f32[2,256], index: 0, kind: input, shape index: {}]   ;;  %s158_s1 = inlined_call_operand.vmem [shape: f32[1,256], index: 1, kind: input, shape index: {}]   ;;  %s159_s2 = inlined_call_operand.hbm [shape: f32[2,256], index: 2, kind: output, shape index: {}]  }
   0x1   :  { %8 = vsyncpa [#allocation4], 0  ;;  %s112_s9 = smov [#allocation2]   ;;  %s64_s13 = scalar_lea.hbm %s157_s0, 64 }
   0x2   :  { %s15_s10 = sshll.u32 %s112_s9, 4  ;;  %p65_p0 = scmp.ne.s32.totalorder %s157_s0, %s64_s13  ;;  %s16_s10 = int_to_ptr.vmem [resolvable:$true] %s15_s10 }
   0x3   :  { %p68_p1 = scmp.lt.u32.totalorder %s64_s13, %s157_s0 }
   0x5   :  { %p70_p2 = pnand %p68_p1, %p65_p0 }
   0x7   :  { %73 = shalt.err (!%p70_p2)
}
   0x8   :  { %s74_s18 = scalar_lea.vmem %s16_s10, 64  ;;  %p79_p4 = scmp.lt.s32.totalorder %s16_s10, %s16_s10 }
   0x9   :  { %p75_p3 = scmp.ne.s32.totalorder %s16_s10, %s74_s18  ;;  %p80_p5 = scmp.lt.s32.totalorder %s74_s18, %s74_s18 }
   0xb   :  { %p81_p6 = por %p80_p5, %p79_p4 }
   0xd   :  { %p82_p7 = pnand %p81_p6, %p75_p3 }
   0xf   :  { %85 = shalt.err (!%p82_p7)
}
  0x10   :  { %18 = dma.hbm_to_vmem [thread:$0]  %s157_s0, 64, %s16_s10, [#allocation3]  }
  0x11   :  { %108 = dma.done.wait [#allocation3], 64  }
  0x12   :  { %109 = vsyncadd [#allocation3], 4294967232  ;;  %v27_v0 = vlaneseq  ;;  %v113_v1 = vmov 1983009808   ;;  %v25_v7 = vld [vmem:[%s158_s1] sm:$0x3] }
  0x13   :  { %v37_v2 = vunpack.c.l.s4 %v113_v1  ;;  %v24_v12 = vld [vmem:[#allocation2] sm:$0xf]  ;;  %s114_s23 = smov [#allocation5]  }
  0x14   :  { %v28_v3 = vshrl.u32 %v27_v0, 7  ;;  %s52_s0 = sshll.u32 %s114_s23, 4  ;;  %s53_s0 = int_to_ptr.vmem [resolvable:$true] %s52_s0 }
  0x15   :  { %v38_v6 = vunpack.c.0.s8 %v37_v2  ;;  %s86_s24 = scalar_lea.vmem %s53_s0, 64  ;;  %p91_p9 = scmp.lt.s32.totalorder %s53_s0, %s53_s0 }
  0x16   :  { %v29_v4 = vsub.s32 0, %v28_v3  ;;  %v33_v5 = vsub.s32 1, %v28_v3  ;;  %p87_p8 = scmp.ne.s32.totalorder %s53_s0, %s86_s24  ;;  %p92_p10 = scmp.lt.s32.totalorder %s86_s24, %s86_s24 }
  0x17   :  { %v41_v10 = vsub.s32 %v38_v6, %v28_v3 }
  0x18   :  { %v30_v8 = vrot.slane %v25_v7, %v29_v4  ;;  %v34_v9 = vrot.slane %v25_v7, %v33_v5  ;;  %p93_p11 = por %p92_p10, %p91_p9 }
  0x1a   :  { %v35_v11 = vcombine.low %v30_v8, %v34_v9  ;;  %p94_p12 = pnand %p93_p11, %p87_p8 }
  0x1c   :  { %v42_v13 = vrot.slane %v35_v11, %v41_v10 }
  0x1e   :  { %v44_v14 = vadd.f32 %v42_v13, %v24_v12 }
  0x20   :  { %45 = vst [vmem:[#allocation5] sm:$0xf] %v44_v14 }
  0x21   :  { %97 = shalt.err (!%p94_p12)
}
  0x22   :  { %s98_s26 = scalar_lea.hbm %s159_s2, 64 }
  0x23   :  { %p99_p13 = scmp.ne.s32.totalorder %s159_s2, %s98_s26  ;;  %p102_p0 = scmp.lt.u32.totalorder %s98_s26, %s159_s2 }
  0x25   :  { %p104_p1 = pnand %p102_p0, %p99_p13 }
  0x27   :  { %107 = shalt.err (!%p104_p1)
}
  0x28   :  { %55 = dma.vmem_to_hbm [thread:$0]  %s53_s0, 64, %s159_s2, [#allocation4]  }
  0x29   :  { %110 = dma.done.wait [#allocation4], 64  }
  0x2a   :  { %111 = vsyncadd [#allocation4], 4294967232 }
  0x2b   :  { %59 = vsyncpa [#allocation3], 1 }
  0x2c   :  { %60 = vsyncpa [#allocation4], 1 }

</bundles_post_ra>
